<compile_context>
chip_gen: v7x
topology: tpu7x:2x2x1
jax: 0.10.0
libtpu: 0.0.40
codegen_flags: <defaults>
</compile_context>

<pallas_src>
import jax
import jax.numpy as jnp
from jax.experimental import pallas as pl
from jax.experimental.pallas import tpu as pltpu


def _round_up(v: int, m: int) -> int:
    return ((v + m - 1) // m) * m


def make_clustering_kernel(alpha: float):
    """Builds the Pallas kernel body with `alpha` baked in."""
    alpha = float(alpha)
    inv_alpha = 1.0 / alpha
    power = (alpha + 1.0) / 2.0
    unit_alpha = (alpha == 1.0)

    def kernel(x_ref, ct_ref, c2_ref, o_ref):
        x = x_ref[...].astype(jnp.float32)       # (TB, D), streamed (native dtype in HBM)
        ct = ct_ref[...]                         # (D, K) resident, already -2 * clusters^T
        c2 = c2_ref[...]                         # (1, K) resident, ||c||^2

        # Squared distances via the MXU-friendly expansion  ||x||^2 + ||c||^2 - 2 x.c
        # (the -2 is folded into ct in the wrapper).
        x2 = jnp.sum(x * x, axis=1, keepdims=True)                    # (TB, 1)
        xc = jnp.dot(x, ct, preferred_element_type=jnp.float32)       # (TB, K)
        d = jnp.maximum(x2 + c2 + xc, 0.0)                            # clamp fp cancellation

        # Student-t kernel; alpha == 1 => power == 1, skip the pow.
        if unit_alpha:
            q = pl.reciprocal(1.0 + d, approx=True)
        else:
            q = pl.reciprocal(1.0 + d * inv_alpha, approx=True)
            q = q ** power

        # Exact divide for the per-row normalization (cheap: only TB values).
        row_sum = jnp.sum(q, axis=1, keepdims=True)
        o_ref[...] = (q / row_sum).astype(o_ref.dtype)

    return kernel


def _vmem_budget_bytes() -> int:
    """Per-generation scoped-VMEM budget: ~half of physical, clamped to [32, 96] MiB."""
    cap = 64 * 1024 * 1024
    try:
        info = pltpu.get_tpu_info()
        cap = int(getattr(info, "vmem_capacity_bytes", cap)) or cap
    except Exception:
        pass
    return max(32 * 1024 * 1024, min(cap // 2, 96 * 1024 * 1024))


def clustering_layer(
    x: jax.Array,
    clusters: jax.Array,
    alpha: float = 1.0,
    *,
    block_batch: int | None = None,
) -> jax.Array:
    """Forward pass of ClusteringLayer as a batch-tiled Pallas call.

    x:        (B, D) float (any float dtype; streamed as-is)
    clusters: (K, D) float
    returns:  (B, K) float32 soft assignments (rows sum to 1)
    """
    B, D = x.shape
    K, D2 = clusters.shape
    assert D == D2, "feature dims must match"

    # ---- wrapper-side layout plumbing (once, tiny) --------------------------
    c = clusters.astype(jnp.float32)
    ct = (-2.0) * c.T                                  # (D, K)  pre-transposed, -2 folded in
    c2 = jnp.sum(c * c, axis=1)[None, :]               # (1, K)

    # ---- per-generation tile sizing -----------------------------------------
    x_itemsize = jnp.dtype(x.dtype).itemsize
    vmem_budget = _vmem_budget_bytes()
    resident_bytes = D * K * 4 + K * 4                  # ct + c2 (f32)
    per_row_bytes = 2 * D * x_itemsize + 2 * K * 4      # double-buffered x tile + out tile
    tile_budget = max(int(0.6 * vmem_budget) - resident_bytes - (4 << 20), 2 << 20)
    tb_vmem = tile_budget // per_row_bytes
    tb_bw = (2 << 20) // max(D * x_itemsize, 1)          # ~2 MiB of streamed x per grid step
    TB = min(tb_vmem, tb_bw, 8192)
    if block_batch is not None:
        TB = min(TB, block_batch)
    TB = max(8, (TB // 8) * 8)                           # sublane-aligned block
    if B <= TB:
        TB = B                                           # full-extent block: any B is legal
    if pl.cdiv(B, TB) < 2 and B >= 16:
        TB = max(8, _round_up((B + 1) // 2, 8))          # >=2 steps so v7x megacore is fed
    num_blocks = pl.cdiv(B, TB)

    kernel = make_clustering_kernel(alpha)

    def _run(resident_specs):
        return pl.pallas_call(
            kernel,
            out_shape=jax.ShapeDtypeStruct((B, K), jnp.float32),
            grid=(num_blocks,),
            in_specs=[pl.BlockSpec((TB, D), lambda i: (i, 0))] + resident_specs,
            out_specs=pl.BlockSpec((TB, K), lambda i: (i, 0)),
            compiler_params=pltpu.CompilerParams(
                dimension_semantics=("parallel",),
                vmem_limit_bytes=int(vmem_budget),
            ),
        )(x, ct, c2)

    try:
        # Resident cluster blocks: constant index_map (fetched once); single
        # buffering halves their VMEM footprint (matters at large D*K on v7x).
        return _run([
            pl.BlockSpec((D, K), lambda i: (0, 0), pipeline_mode=pl.Buffered(1)),
            pl.BlockSpec((1, K), lambda i: (0, 0), pipeline_mode=pl.Buffered(1)),
        ])
    except Exception:
        # Fallback if this jax version rejects single-buffered pipeline_mode.
        return _run([
            pl.BlockSpec((D, K), lambda i: (0, 0)),
            pl.BlockSpec((1, K), lambda i: (0, 0)),
        ])


# ------------------------------ self-test ------------------------------------

def _xavier_uniform(key, shape, dtype=jnp.float32):
    """Matches torch.nn.init.xavier_uniform_ for a 2-D (fan_out, fan_in) tensor."""
    fan_out, fan_in = shape
    bound = (6.0 / (fan_in + fan_out)) ** 0.5
    return jax.random.uniform(key, shape, dtype=dtype, minval=-bound, maxval=bound)


def _reference(x, clusters, alpha):
    x = x.astype(jnp.float32)
    d = jnp.sum((x[:, None, :] - clusters[None, :, :]) ** 2, axis=2)
    q = 1.0 / (1.0 + d / alpha)
    q = q ** ((alpha + 1.0) / 2.0)
    return q / jnp.sum(q, axis=1, keepdims=True)


if __name__ == "__main__":
    key = jax.random.PRNGKey(0)
    k1, k2, k3, k4, k5, k6 = jax.random.split(key, 6)

    # Case 1: standard DEC setting (alpha = 1, f32, single full block).
    B, D, K = 8, 32, 10
    x = jax.random.normal(k1, (B, D), dtype=jnp.float32)
    cl = _xavier_uniform(k2, (K, D))
    q = jax.block_until_ready(clustering_layer(x, cl, alpha=1.0))
    assert q.shape == (B, K)
    assert jnp.allclose(q, _reference(x, cl, 1.0), atol=2e-3, rtol=2e-3)
    assert jnp.allclose(jnp.sum(q, axis=1), jnp.ones((B,)), atol=1e-3)

    # Case 2: alpha != 1 (pow path), batch not a multiple of 8.
    B2, D2, K2 = 13, 32, 7
    x2 = jax.random.normal(k3, (B2, D2), dtype=jnp.float32)
    cl2 = _xavier_uniform(k4, (K2, D2))
    q2 = jax.block_until_ready(clustering_layer(x2, cl2, alpha=2.0))
    assert q2.shape == (B2, K2)
    assert jnp.allclose(q2, _reference(x2, cl2, 2.0), atol=2e-3, rtol=2e-3)
    assert jnp.allclose(jnp.sum(q2, axis=1), jnp.ones((B2,)), atol=1e-3)

    # Case 3: multi-step grid with a ragged last block (no wrapper pad) and
    # bf16 x streamed in its native dtype.
    B3, D3, K3 = 203, 32, 10
    x3 = jax.random.normal(k5, (B3, D3), dtype=jnp.float32).astype(jnp.bfloat16)
    cl3 = _xavier_uniform(k6, (K3, D3))
    q3 = jax.block_until_ready(clustering_layer(x3, cl3, alpha=1.0, block_batch=64))
    assert q3.shape == (B3, K3)
    assert jnp.allclose(q3, _reference(x3, cl3, 1.0), atol=2e-3, rtol=2e-3)
    assert jnp.allclose(jnp.sum(q3, axis=1), jnp.ones((B3,)), atol=1e-3)

    print("KERNEL_OK")
</pallas_src>

<mosaic_0001>
module attributes {stable_mosaic.version = 11 : i64} {
  func.func @kernel(%arg0: i32, %arg1: memref<8x32xf32, #tpu.memory_space<vmem>>, %arg2: memref<32x10xf32, #tpu.memory_space<vmem>>, %arg3: memref<1x10xf32, #tpu.memory_space<vmem>>, %arg4: memref<8x10xf32, #tpu.memory_space<vmem>>) attributes {dimension_semantics = [#tpu.dimension_semantics<parallel>], iteration_bounds = array<i64: 1>, scalar_prefetch = 0 : i64, scratch_operands = 0 : i64, tpu.core_type = #tpu.core_type<tc>, window_params = [{transform_indices = @transform_0, window_bounds = array<i64: 8, 32>}, {pipeline_mode = #tpu.pipeline_mode<synchronous>, transform_indices = @transform_1, window_bounds = array<i64: 32, 10>}, {pipeline_mode = #tpu.pipeline_mode<synchronous>, transform_indices = @transform_2, window_bounds = array<i64: 1, 10>}, {transform_indices = @transform_3, window_bounds = array<i64: 8, 10>}]} {
    %c0 = arith.constant 0 : index
    %c0_0 = arith.constant 0 : index
    %0 = vector.load %arg1[%c0, %c0_0] : memref<8x32xf32, #tpu.memory_space<vmem>>, vector<8x32xf32>
    %c0_1 = arith.constant 0 : index
    %c0_2 = arith.constant 0 : index
    %1 = vector.load %arg2[%c0_1, %c0_2] : memref<32x10xf32, #tpu.memory_space<vmem>>, vector<32x10xf32>
    %c0_3 = arith.constant 0 : index
    %c0_4 = arith.constant 0 : index
    %2 = vector.load %arg3[%c0_3, %c0_4] : memref<1x10xf32, #tpu.memory_space<vmem>>, vector<1x10xf32>
    %3 = arith.mulf %0, %0 : vector<8x32xf32>
    %cst = arith.constant dense<0.000000e+00> : vector<8xf32>
    %4 = vector.multi_reduction <add>, %3, %cst [1] : vector<8x32xf32> to vector<8xf32>
    %5 = vector.shape_cast %4 : vector<8xf32> to vector<8x1xf32>
    %cst_5 = arith.constant dense<0.000000e+00> : vector<8x10xf32>
    %6 = tpu.matmul %0, %1, %cst_5 {dimension_numbers = #tpu.dot_dimension_numbers<[1], [0], [0], [1], [0, 0, 1, 1], [], []>} : vector<8x32xf32>, vector<32x10xf32>, vector<8x10xf32> -> vector<8x10xf32>
    %7 = vector.broadcast %5 : vector<8x1xf32> to vector<8x10xf32>
    %8 = vector.broadcast %2 : vector<1x10xf32> to vector<8x10xf32>
    %9 = arith.addf %7, %8 : vector<8x10xf32>
    %10 = arith.addf %9, %6 : vector<8x10xf32>
    %cst_6 = arith.constant 0.000000e+00 : f32
    %11 = vector.broadcast %cst_6 : f32 to vector<8x10xf32>
    %12 = arith.maximumf %10, %11 : vector<8x10xf32>
    %cst_7 = arith.constant 1.000000e+00 : f32
    %13 = vector.broadcast %cst_7 : f32 to vector<8x10xf32>
    %14 = arith.addf %13, %12 : vector<8x10xf32>
    %15 = tpu.reciprocal %14 {approx = true} : vector<8x10xf32> -> vector<8x10xf32>
    %cst_8 = arith.constant dense<0.000000e+00> : vector<8xf32>
    %16 = vector.multi_reduction <add>, %15, %cst_8 [1] : vector<8x10xf32> to vector<8xf32>
    %17 = vector.shape_cast %16 : vector<8xf32> to vector<8x1xf32>
    %18 = vector.broadcast %17 : vector<8x1xf32> to vector<8x10xf32>
    %19 = arith.divf %15, %18 : vector<8x10xf32>
    %c0_9 = arith.constant 0 : index
    %c0_10 = arith.constant 0 : index
    %20 = vector.load %arg4[%c0_9, %c0_10] : memref<8x10xf32, #tpu.memory_space<vmem>>, vector<8x10xf32>
    tpu.vector_store %arg4[%c0_9, %c0_10], %19 {strides = array<i32>} : memref<8x10xf32, #tpu.memory_space<vmem>>, vector<8x10xf32>,
    return
  }
  func.func @transform_0(%arg0: i32) -> (i32, i32) {
    %c0_i32 = arith.constant 0 : i32
    %c0_i32_0 = arith.constant 0 : i32
    return %arg0, %c0_i32 : i32, i32
  }
  func.func @transform_1(%arg0: i32) -> (i32, i32) {
    %c0_i32 = arith.constant 0 : i32
    %c0_i32_0 = arith.constant 0 : i32
    %c0_i32_1 = arith.constant 0 : i32
    return %c0_i32, %c0_i32_0 : i32, i32
  }
  func.func @transform_2(%arg0: i32) -> (i32, i32) {
    %c0_i32 = arith.constant 0 : i32
    %c0_i32_0 = arith.constant 0 : i32
    %c0_i32_1 = arith.constant 0 : i32
    return %c0_i32, %c0_i32_0 : i32, i32
  }
  func.func @transform_3(%arg0: i32) -> (i32, i32) {
    %c0_i32 = arith.constant 0 : i32
    %c0_i32_0 = arith.constant 0 : i32
    return %arg0, %c0_i32 : i32, i32
  }
}

module attributes {stable_mosaic.version = 11 : i64} {
  func.func @kernel(%arg0: i32, %arg1: memref<8x32xf32, #tpu.memory_space<vmem>>, %arg2: memref<32x10xf32, #tpu.memory_space<vmem>>, %arg3: memref<1x10xf32, #tpu.memory_space<vmem>>, %arg4: memref<8x10xf32, #tpu.memory_space<vmem>>) attributes {dimension_semantics = [#tpu.dimension_semantics<parallel>], iteration_bounds = array<i64: 1>, scalar_prefetch = 0 : i64, scratch_operands = 0 : i64, tpu.core_type = #tpu.core_type<tc>, window_params = [{transform_indices = @transform_0, window_bounds = array<i64: 8, 32>}, {pipeline_mode = #tpu.pipeline_mode<synchronous>, transform_indices = @transform_1, window_bounds = array<i64: 32, 10>}, {pipeline_mode = #tpu.pipeline_mode<synchronous>, transform_indices = @transform_2, window_bounds = array<i64: 1, 10>}, {transform_indices = @transform_3, window_bounds = array<i64: 8, 10>}]} {
    %c0 = arith.constant 0 : index
    %c0_0 = arith.constant 0 : index
    %0 = vector.load %arg1[%c0, %c0_0] : memref<8x32xf32, #tpu.memory_space<vmem>>, vector<8x32xf32>
    %c0_1 = arith.constant 0 : index
    %c0_2 = arith.constant 0 : index
    %1 = vector.load %arg2[%c0_1, %c0_2] : memref<32x10xf32, #tpu.memory_space<vmem>>, vector<32x10xf32>
    %c0_3 = arith.constant 0 : index
    %c0_4 = arith.constant 0 : index
    %2 = vector.load %arg3[%c0_3, %c0_4] : memref<1x10xf32, #tpu.memory_space<vmem>>, vector<1x10xf32>
    %3 = arith.mulf %0, %0 : vector<8x32xf32>
    %cst = arith.constant dense<0.000000e+00> : vector<8xf32>
    %4 = vector.multi_reduction <add>, %3, %cst [1] : vector<8x32xf32> to vector<8xf32>
    %5 = vector.shape_cast %4 : vector<8xf32> to vector<8x1xf32>
    %cst_5 = arith.constant dense<0.000000e+00> : vector<8x10xf32>
    %6 = tpu.matmul %0, %1, %cst_5 {dimension_numbers = #tpu.dot_dimension_numbers<[1], [0], [0], [1], [0, 0, 1, 1], [], []>} : vector<8x32xf32>, vector<32x10xf32>, vector<8x10xf32> -> vector<8x10xf32>
    %7 = vector.broadcast %5 : vector<8x1xf32> to vector<8x10xf32>
    %8 = vector.broadcast %2 : vector<1x10xf32> to vector<8x10xf32>
    %9 = arith.addf %7, %8 : vector<8x10xf32>
    %10 = arith.addf %9, %6 : vector<8x10xf32>
    %cst_6 = arith.constant 0.000000e+00 : f32
    %11 = vector.broadcast %cst_6 : f32 to vector<8x10xf32>
    %12 = arith.maximumf %10, %11 : vector<8x10xf32>
    %cst_7 = arith.constant 1.000000e+00 : f32
    %13 = vector.broadcast %cst_7 : f32 to vector<8x10xf32>
    %14 = arith.addf %13, %12 : vector<8x10xf32>
    %15 = tpu.reciprocal %14 {approx = true} : vector<8x10xf32> -> vector<8x10xf32>
    %cst_8 = arith.constant dense<0.000000e+00> : vector<8xf32>
    %16 = vector.multi_reduction <add>, %15, %cst_8 [1] : vector<8x10xf32> to vector<8xf32>
    %17 = vector.shape_cast %16 : vector<8xf32> to vector<8x1xf32>
    %18 = vector.broadcast %17 : vector<8x1xf32> to vector<8x10xf32>
    %19 = arith.divf %15, %18 : vector<8x10xf32>
    %c0_9 = arith.constant 0 : index
    %c0_10 = arith.constant 0 : index
    %20 = vector.load %arg4[%c0_9, %c0_10] : memref<8x10xf32, #tpu.memory_space<vmem>>, vector<8x10xf32>
    tpu.vector_store %arg4[%c0_9, %c0_10], %19 {strides = array<i32>} : memref<8x10xf32, #tpu.memory_space<vmem>>, vector<8x10xf32>,
    return
  }
  func.func @transform_0(%arg0: i32) -> (i32, i32) {
    %c0_i32 = arith.constant 0 : i32
    %c0_i32_0 = arith.constant 0 : i32
    return %arg0, %c0_i32 : i32, i32
  }
  func.func @transform_1(%arg0: i32) -> (i32, i32) {
    %c0_i32 = arith.constant 0 : i32
    %c0_i32_0 = arith.constant 0 : i32
    %c0_i32_1 = arith.constant 0 : i32
    return %c0_i32, %c0_i32_0 : i32, i32
  }
  func.func @transform_2(%arg0: i32) -> (i32, i32) {
    %c0_i32 = arith.constant 0 : i32
    %c0_i32_0 = arith.constant 0 : i32
    %c0_i32_1 = arith.constant 0 : i32
    return %c0_i32, %c0_i32_0 : i32, i32
  }
  func.func @transform_3(%arg0: i32) -> (i32, i32) {
    %c0_i32 = arith.constant 0 : i32
    %c0_i32_0 = arith.constant 0 : i32
    return %arg0, %c0_i32 : i32, i32
  }
}

</mosaic_0001>

<bundles_post_ra>
// kernel: tpu_custom_call.1
= control target key start
LH: loop header
LB: loop body
LE: loop exit
PB: predicated region body
PF: predicated region fallthrough
CT: control target
= control target key end

     0   :  { %v187_v3 = vmov 0.0|0.0   ;;  %vm188_vm0 = vmmov 0   ;;  %v189_v6 = vmov 0.0   ;;  %s241_s0 = inlined_call_operand.vmem [shape: f32[8,32], index: 0, kind: input, shape index: {}]   ;;  %s242_s1 = inlined_call_operand.vmem [shape: f32[32,10], index: 1, kind: input, shape index: {}]   ;;  %s243_s2 = inlined_call_operand.vmem [shape: f32[1,10], index: 2, kind: input, shape index: {}]   ;;  %s244_s3 = inlined_call_operand.hbm [shape: f32[8,10], index: 3, kind: output, shape index: {}]  }
   0x1   :  { %v16_v0 = vld [vmem:[%s242_s1] sm:$0xff]  ;;  %v17_v1 = vld [vmem:[%s242_s1 + $0x8] sm:$0xff]  ;;  %v18_v2 = vld [vmem:[%s242_s1 + $0x10] sm:$0xff]  ;;  %149 = vmatprep.subr.bf16.mxu0 %v187_v3  ;;  %146 = vmatprep.mubr.msk.f32.mxu0 %vm188_vm0, %v189_v6 }
   0x2   :  { %v150_v4 = vpack.c.bf16 %v17_v1, %v16_v0  ;;  %v19_v5 = vld [vmem:[%s242_s1 + $0x18] sm:$0xff]  ;;  %v15_v7 = vld [vmem:[%s241_s0] sm:$0xff] }
   0x3   :  { %v21_v8 = vmul.f32 %v15_v7, %v15_v7 }
   0x4   :  { %8 = vsyncpa [#allocation3], 0  ;;  %151 = vmatpush3.bf16.msra.mxu0 %v150_v4  ;;  %v153_v9 = vpack.c.bf16 %v19_v5, %v18_v2  ;;  %vm22_vm1 = vcmask 261120   ;;  %v132_v11 = vld [vmem:[%s243_s2] ss:$0 sm:$0xff]  ;;  %vm110_vm2 = vcmask 80896  }
   0x5   :  { %152 = vmatprep.subr.bf16.mxu0 %v187_v3  ;;  %v23_v10 = vsel %vm22_vm1, %v21_v8, 0.0  ;;  %s190_s0 = smov [#allocation2]  }
   0x6   :  { %24 = vadd.xlane.f32.xlu0 %v23_v10  ;;  %s123_s1 = sshll.u32 %s190_s0, 4  ;;  %s124_s1 = int_to_ptr.vmem [resolvable:$true] %s123_s1 }
   0x7   :  { %s163_s2 = scalar_lea.vmem %s124_s1, 128  ;;  %p168_p1 = scmp.lt.s32.totalorder %s124_s1, %s124_s1 }
   0x8   :  { %154 = vmatpush3.bf16.msra.mxu0 %v153_v9  ;;  %p164_p0 = scmp.ne.s32.totalorder %s124_s1, %s163_s2  ;;  %p169_p2 = scmp.lt.s32.totalorder %s163_s2, %s163_s2 }
   0xa   :  { %p170_p3 = por %p169_p2, %p168_p1 }
   0xb   :  { %147 = vmatmul.mubr.msk.f32.vlgmr.msra.gmra.mrb[0].mxu0 %vm22_vm1, %v15_v7 }
   0xc   :  { %p171_p4 = pnand %p170_p3, %p164_p0 }
  0x93   :  { %v25_v12 = vpop.xlane.xlu0 %24 }
  0x94   :  { %v105_v13 = vadd.f32 %v132_v11, %v25_v12 }
  0xde   :  { %v95_v14 = vpop.f32.mrb[0].mxu0 }
  0xdf   :  { %v106_v15 = vadd.f32 %v105_v13, %v95_v14  ;;  %v148_v16 = vpop.f32.mrb[1].mxu0 }
  0xe1   :  { %v107_v17 = vmax.f32 %v106_v15, 0.0 }
  0xe3   :  { %v108_v18 = vadd.f32 1.0, %v107_v17 }
  0xe5   :  { %159 = vrcp.f32 %v108_v18 }
  0xef   :  { %v160_v19 = vpop.eup %159 }
  0xf0   :  { %v111_v20 = vsel %vm110_vm2, %v160_v19, 0.0 }
  0xf1   :  { %112 = vadd.xlane.f32.xlu0 %v111_v20 }
 0x17e   :  { %v113_v21 = vpop.xlane.xlu0 %112 }
 0x17f   :  { %161 = vrcp.f32 %v113_v21 }
 0x189   :  { %v162_v22 = vpop.eup %161 }
 0x18a   :  { %v115_v23 = vmul.f32 %v162_v22, %v160_v19 }
 0x18c   :  { %116 = vst.msk [vmem:[#allocation2] sm:$0xff] %vm110_vm2, %v115_v23 }
 0x18d   :  { %174 = shalt.err (!%p171_p4)
}
 0x18e   :  { %s175_s26 = scalar_lea.hbm %s244_s3, 128 }
 0x18f   :  { %p176_p5 = scmp.ne.s32.totalorder %s244_s3, %s175_s26  ;;  %p179_p6 = scmp.lt.u32.totalorder %s175_s26, %s244_s3 }
 0x191   :  { %p181_p7 = pnand %p179_p6, %p176_p5 }
 0x193   :  { %184 = shalt.err (!%p181_p7)
}
 0x194   :  { %126 = dma.vmem_to_hbm [thread:$0]  %s124_s1, 128, %s244_s3, [#allocation3]  }
 0x195   :  { %185 = dma.done.wait [#allocation3], 128  }
 0x196   :  { %186 = vsyncadd [#allocation3], 4294967168 }
 0x197   :  { %130 = vsyncpa [#allocation3], 1 }

// kernel: tpu_custom_call.1
= control target key start
LH: loop header
LB: loop body
LE: loop exit
PB: predicated region body
PF: predicated region fallthrough
CT: control target
= control target key end

     0   :  { %v187_v3 = vmov 0.0|0.0   ;;  %vm188_vm0 = vmmov 0   ;;  %v189_v6 = vmov 0.0   ;;  %s241_s0 = inlined_call_operand.vmem [shape: f32[8,32], index: 0, kind: input, shape index: {}]   ;;  %s242_s1 = inlined_call_operand.vmem [shape: f32[32,10], index: 1, kind: input, shape index: {}]   ;;  %s243_s2 = inlined_call_operand.vmem [shape: f32[1,10], index: 2, kind: input, shape index: {}]   ;;  %s244_s3 = inlined_call_operand.hbm [shape: f32[8,10], index: 3, kind: output, shape index: {}]  }
   0x1   :  { %v16_v0 = vld [vmem:[%s242_s1] sm:$0xff]  ;;  %v17_v1 = vld [vmem:[%s242_s1 + $0x8] sm:$0xff]  ;;  %v18_v2 = vld [vmem:[%s242_s1 + $0x10] sm:$0xff]  ;;  %149 = vmatprep.subr.bf16.mxu0 %v187_v3  ;;  %146 = vmatprep.mubr.msk.f32.mxu0 %vm188_vm0, %v189_v6 }
   0x2   :  { %v150_v4 = vpack.c.bf16 %v17_v1, %v16_v0  ;;  %v19_v5 = vld [vmem:[%s242_s1 + $0x18] sm:$0xff]  ;;  %v15_v7 = vld [vmem:[%s241_s0] sm:$0xff] }
   0x3   :  { %v21_v8 = vmul.f32 %v15_v7, %v15_v7 }
   0x4   :  { %8 = vsyncpa [#allocation3], 0  ;;  %151 = vmatpush3.bf16.msra.mxu0 %v150_v4  ;;  %v153_v9 = vpack.c.bf16 %v19_v5, %v18_v2  ;;  %vm22_vm1 = vcmask 261120   ;;  %v132_v11 = vld [vmem:[%s243_s2] ss:$0 sm:$0xff]  ;;  %vm110_vm2 = vcmask 80896  }
   0x5   :  { %152 = vmatprep.subr.bf16.mxu0 %v187_v3  ;;  %v23_v10 = vsel %vm22_vm1, %v21_v8, 0.0  ;;  %s190_s0 = smov [#allocation2]  }
   0x6   :  { %24 = vadd.xlane.f32.xlu0 %v23_v10  ;;  %s123_s1 = sshll.u32 %s190_s0, 4  ;;  %s124_s1 = int_to_ptr.vmem [resolvable:$true] %s123_s1 }
   0x7   :  { %s163_s2 = scalar_lea.vmem %s124_s1, 128  ;;  %p168_p1 = scmp.lt.s32.totalorder %s124_s1, %s124_s1 }
   0x8   :  { %154 = vmatpush3.bf16.msra.mxu0 %v153_v9  ;;  %p164_p0 = scmp.ne.s32.totalorder %s124_s1, %s163_s2  ;;  %p169_p2 = scmp.lt.s32.totalorder %s163_s2, %s163_s2 }
   0xa   :  { %p170_p3 = por %p169_p2, %p168_p1 }
   0xb   :  { %147 = vmatmul.mubr.msk.f32.vlgmr.msra.gmra.mrb[0].mxu0 %vm22_vm1, %v15_v7 }
   0xc   :  { %p171_p4 = pnand %p170_p3, %p164_p0 }
  0x93   :  { %v25_v12 = vpop.xlane.xlu0 %24 }
  0x94   :  { %v105_v13 = vadd.f32 %v132_v11, %v25_v12 }
  0xde   :  { %v95_v14 = vpop.f32.mrb[0].mxu0 }
  0xdf   :  { %v106_v15 = vadd.f32 %v105_v13, %v95_v14  ;;  %v148_v16 = vpop.f32.mrb[1].mxu0 }
  0xe1   :  { %v107_v17 = vmax.f32 %v106_v15, 0.0 }
  0xe3   :  { %v108_v18 = vadd.f32 1.0, %v107_v17 }
  0xe5   :  { %159 = vrcp.f32 %v108_v18 }
  0xef   :  { %v160_v19 = vpop.eup %159 }
  0xf0   :  { %v111_v20 = vsel %vm110_vm2, %v160_v19, 0.0 }
  0xf1   :  { %112 = vadd.xlane.f32.xlu0 %v111_v20 }
 0x17e   :  { %v113_v21 = vpop.xlane.xlu0 %112 }
 0x17f   :  { %161 = vrcp.f32 %v113_v21 }
 0x189   :  { %v162_v22 = vpop.eup %161 }
 0x18a   :  { %v115_v23 = vmul.f32 %v162_v22, %v160_v19 }
 0x18c   :  { %116 = vst.msk [vmem:[#allocation2] sm:$0xff] %vm110_vm2, %v115_v23 }
 0x18d   :  { %174 = shalt.err (!%p171_p4)
}
 0x18e   :  { %s175_s26 = scalar_lea.hbm %s244_s3, 128 }
 0x18f   :  { %p176_p5 = scmp.ne.s32.totalorder %s244_s3, %s175_s26  ;;  %p179_p6 = scmp.lt.u32.totalorder %s175_s26, %s244_s3 }
 0x191   :  { %p181_p7 = pnand %p179_p6, %p176_p5 }
 0x193   :  { %184 = shalt.err (!%p181_p7)
}
 0x194   :  { %126 = dma.vmem_to_hbm [thread:$0]  %s124_s1, 128, %s244_s3, [#allocation3]  }
 0x195   :  { %185 = dma.done.wait [#allocation3], 128  }
 0x196   :  { %186 = vsyncadd [#allocation3], 4294967168 }
 0x197   :  { %130 = vsyncpa [#allocation3], 1 }

</bundles_post_ra>
